<compile_context>
chip_gen: v6e
topology: v6e:2x2x1
jax: 0.10.0
libtpu: 0.0.40
codegen_flags: <defaults>
</compile_context>

<pallas_src>
import jax
import jax.numpy as jnp
from jax.experimental import pallas as pl
from jax.experimental.pallas import tpu as pltpu


def _mlp_kernel(x_ref,
                w1_ref, b1_ref,
                w2_ref, b2_ref,
                w3_ref, b3_ref,
                w4t_ref, b4_ref,
                o_ref):
    x = x_ref[...]

    # Layer 1: Linear(input_size, 64) + ReLU   (Dropout -> identity at inference)
    h = jnp.dot(x, w1_ref[...], preferred_element_type=jnp.float32) + b1_ref[...]
    h = jnp.maximum(h, 0.0)

    # Layer 2: Linear(64, 32) + ReLU           (Dropout -> identity at inference)
    h = jnp.dot(h, w2_ref[...], preferred_element_type=jnp.float32) + b2_ref[...]
    h = jnp.maximum(h, 0.0)

    # Layer 3: Linear(32, 16) + ReLU
    h = jnp.dot(h, w3_ref[...], preferred_element_type=jnp.float32) + b3_ref[...]
    h = jnp.maximum(h, 0.0)

    # Layer 4: Linear(16, 1) + Sigmoid.
    # Output width 1 -> a matmul would waste a full MXU push/pop for one useful
    # lane.  Use a VPU broadcast-multiply + lane reduce (w4 passed as (1, 16)).
    logits = jnp.sum(h * w4t_ref[...], axis=-1, keepdims=True) + b4_ref[...]
    o_ref[...] = jax.nn.sigmoid(logits)


def _round_up(n, m):
    return ((n + m - 1) // m) * m


def injury_prediction_forward(x, params, *, tile_rows=2048):
    """x: (batch, input_size) f32. params: dict of weights/biases. Returns (batch, 1) f32."""
    B, F = x.shape
    w1, b1 = params["w1"], params["b1"]
    w2, b2 = params["w2"], params["b2"]
    w3, b3 = params["w3"], params["b3"]
    w4, b4 = params["w4"], params["b4"]
    # (16, 1) column -> (1, 16) row for the in-kernel lane reduce.
    w4t = w4.reshape(1, w4.shape[0])

    # Batch tile: multiple of 256 (MXU M-dim on v6e/v7x, also a multiple of 128
    # for v5e), large enough to amortize per-grid-step overhead, small enough
    # (tile_rows * F * 4 bytes, double-buffered) to fit v7x's 64 MiB VMEM easily.
    TB = min(tile_rows, _round_up(max(B, 1), 256))
    Bp = _round_up(B, TB)
    if Bp != B:
        x = jnp.pad(x, ((0, Bp - B), (0, 0)))
    num_tiles = Bp // TB

    def resident(arr):
        # Constant index_map: same block every grid step -> params are fetched
        # once and stay resident in VMEM.
        return pl.BlockSpec(arr.shape, lambda i: tuple(0 for _ in arr.shape))

    param_bytes = sum(int(a.size) * a.dtype.itemsize
                      for a in (w1, b1, w2, b2, w3, b3, w4t, b4))
    cost = pl.CostEstimate(
        flops=2 * Bp * (F * 64 + 64 * 32 + 32 * 16 + 16 * 1),
        transcendentals=Bp,  # one exp per row for the sigmoid
        bytes_accessed=Bp * F * 4 + Bp * 4 + param_bytes,
    )

    out = pl.pallas_call(
        _mlp_kernel,
        out_shape=jax.ShapeDtypeStruct((Bp, 1), jnp.float32),
        grid=(num_tiles,),
        in_specs=[
            pl.BlockSpec((TB, F), lambda i: (i, 0)),
            resident(w1), resident(b1),
            resident(w2), resident(b2),
            resident(w3), resident(b3),
            resident(w4t), resident(b4),
        ],
        out_specs=pl.BlockSpec((TB, 1), lambda i: (i, 0)),
        compiler_params=pltpu.CompilerParams(
            dimension_semantics=("parallel",)),
        cost_estimate=cost,
    )(x, w1, b1, w2, b2, w3, b3, w4t, b4)

    return out[:B]


def init_params(key, input_size):
    """Deterministic synthetic init (PyTorch-like uniform fan-in scaling)."""
    sizes = [(input_size, 64), (64, 32), (32, 16), (16, 1)]
    params = {}
    for idx, (fan_in, fan_out) in enumerate(sizes, start=1):
        key, kw, kb = jax.random.split(key, 3)
        bound = 1.0 / jnp.sqrt(fan_in)
        params[f"w{idx}"] = jax.random.uniform(
            kw, (fan_in, fan_out), jnp.float32, -bound, bound)
        # Bias kept 2D (1, fan_out) so it stays a clean (sublane, lane) tile.
        params[f"b{idx}"] = jax.random.uniform(
            kb, (1, fan_out), jnp.float32, -bound, bound)
    return params


def reference_forward(x, params):
    h = jnp.maximum(x @ params["w1"] + params["b1"], 0.0)
    h = jnp.maximum(h @ params["w2"] + params["b2"], 0.0)
    h = jnp.maximum(h @ params["w3"] + params["b3"], 0.0)
    return jax.nn.sigmoid(h @ params["w4"] + params["b4"])


if __name__ == "__main__":
    key = jax.random.PRNGKey(0)
    key, kx, kx2 = jax.random.split(key, 3)

    batch = 2
    input_size = 32
    params = init_params(key, input_size)

    # Small-batch check (single padded tile).
    x = jax.random.normal(kx, (batch, input_size), dtype=jnp.float32)
    out = jax.block_until_ready(injury_prediction_forward(x, params))
    ref = reference_forward(x, params)
    assert out.shape == (batch, 1)
    assert jnp.allclose(out, ref, atol=1e-5, rtol=1e-5), "mismatch vs reference (small batch)"

    # Multi-tile + padding check (exercises the batch grid and resident weights).
    batch2 = 600
    x2 = jax.random.normal(kx2, (batch2, input_size), dtype=jnp.float32)
    out2 = jax.block_until_ready(
        injury_prediction_forward(x2, params, tile_rows=256))
    ref2 = reference_forward(x2, params)
    assert out2.shape == (batch2, 1)
    assert jnp.allclose(out2, ref2, atol=1e-5, rtol=1e-5), "mismatch vs reference (tiled batch)"

    print("KERNEL_OK")
</pallas_src>

<mosaic_0001>
module attributes {stable_mosaic.version = 11 : i64} {
  func.func @_mlp_kernel(%arg0: i32, %arg1: memref<256x32xf32, #tpu.memory_space<vmem>>, %arg2: memref<32x64xf32, #tpu.memory_space<vmem>>, %arg3: memref<1x64xf32, #tpu.memory_space<vmem>>, %arg4: memref<64x32xf32, #tpu.memory_space<vmem>>, %arg5: memref<1x32xf32, #tpu.memory_space<vmem>>, %arg6: memref<32x16xf32, #tpu.memory_space<vmem>>, %arg7: memref<1x16xf32, #tpu.memory_space<vmem>>, %arg8: memref<1x16xf32, #tpu.memory_space<vmem>>, %arg9: memref<1x1xf32, #tpu.memory_space<vmem>>, %arg10: memref<256x1xf32, #tpu.memory_space<vmem>>) attributes {dimension_semantics = [#tpu.dimension_semantics<parallel>], iteration_bounds = array<i64: 1>, scalar_prefetch = 0 : i64, scratch_operands = 0 : i64, tpu.core_type = #tpu.core_type<tc>, window_params = [{transform_indices = @transform_0, window_bounds = array<i64: 256, 32>}, {pipeline_mode = #tpu.pipeline_mode<synchronous>, transform_indices = @transform_1, window_bounds = array<i64: 32, 64>}, {pipeline_mode = #tpu.pipeline_mode<synchronous>, transform_indices = @transform_2, window_bounds = array<i64: 1, 64>}, {pipeline_mode = #tpu.pipeline_mode<synchronous>, transform_indices = @transform_3, window_bounds = array<i64: 64, 32>}, {pipeline_mode = #tpu.pipeline_mode<synchronous>, transform_indices = @transform_4, window_bounds = array<i64: 1, 32>}, {pipeline_mode = #tpu.pipeline_mode<synchronous>, transform_indices = @transform_5, window_bounds = array<i64: 32, 16>}, {pipeline_mode = #tpu.pipeline_mode<synchronous>, transform_indices = @transform_6, window_bounds = array<i64: 1, 16>}, {pipeline_mode = #tpu.pipeline_mode<synchronous>, transform_indices = @transform_7, window_bounds = array<i64: 1, 16>}, {pipeline_mode = #tpu.pipeline_mode<synchronous>, transform_indices = @transform_8, window_bounds = array<i64: 1, 1>}, {transform_indices = @transform_9, window_bounds = array<i64: 256, 1>}]} {
    %c0 = arith.constant 0 : index
    %c0_0 = arith.constant 0 : index
    %0 = vector.load %arg1[%c0, %c0_0] : memref<256x32xf32, #tpu.memory_space<vmem>>, vector<256x32xf32>
    %c0_1 = arith.constant 0 : index
    %c0_2 = arith.constant 0 : index
    %1 = vector.load %arg2[%c0_1, %c0_2] : memref<32x64xf32, #tpu.memory_space<vmem>>, vector<32x64xf32>
    %cst = arith.constant dense<0.000000e+00> : vector<256x64xf32>
    %2 = tpu.matmul %0, %1, %cst {dimension_numbers = #tpu.dot_dimension_numbers<[1], [0], [0], [1], [0, 0, 1, 1], [], []>} : vector<256x32xf32>, vector<32x64xf32>, vector<256x64xf32> -> vector<256x64xf32>
    %c0_3 = arith.constant 0 : index
    %c0_4 = arith.constant 0 : index
    %3 = vector.load %arg3[%c0_3, %c0_4] : memref<1x64xf32, #tpu.memory_space<vmem>>, vector<1x64xf32>
    %4 = vector.broadcast %3 : vector<1x64xf32> to vector<256x64xf32>
    %5 = arith.addf %2, %4 : vector<256x64xf32>
    %cst_5 = arith.constant 0.000000e+00 : f32
    %6 = vector.broadcast %cst_5 : f32 to vector<256x64xf32>
    %7 = arith.maximumf %5, %6 : vector<256x64xf32>
    %c0_6 = arith.constant 0 : index
    %c0_7 = arith.constant 0 : index
    %8 = vector.load %arg4[%c0_6, %c0_7] : memref<64x32xf32, #tpu.memory_space<vmem>>, vector<64x32xf32>
    %cst_8 = arith.constant dense<0.000000e+00> : vector<256x32xf32>
    %9 = tpu.matmul %7, %8, %cst_8 {dimension_numbers = #tpu.dot_dimension_numbers<[1], [0], [0], [1], [0, 0, 1, 1], [], []>} : vector<256x64xf32>, vector<64x32xf32>, vector<256x32xf32> -> vector<256x32xf32>
    %c0_9 = arith.constant 0 : index
    %c0_10 = arith.constant 0 : index
    %10 = vector.load %arg5[%c0_9, %c0_10] : memref<1x32xf32, #tpu.memory_space<vmem>>, vector<1x32xf32>
    %11 = vector.broadcast %10 : vector<1x32xf32> to vector<256x32xf32>
    %12 = arith.addf %9, %11 : vector<256x32xf32>
    %cst_11 = arith.constant 0.000000e+00 : f32
    %13 = vector.broadcast %cst_11 : f32 to vector<256x32xf32>
    %14 = arith.maximumf %12, %13 : vector<256x32xf32>
    %c0_12 = arith.constant 0 : index
    %c0_13 = arith.constant 0 : index
    %15 = vector.load %arg6[%c0_12, %c0_13] : memref<32x16xf32, #tpu.memory_space<vmem>>, vector<32x16xf32>
    %cst_14 = arith.constant dense<0.000000e+00> : vector<256x16xf32>
    %16 = tpu.matmul %14, %15, %cst_14 {dimension_numbers = #tpu.dot_dimension_numbers<[1], [0], [0], [1], [0, 0, 1, 1], [], []>} : vector<256x32xf32>, vector<32x16xf32>, vector<256x16xf32> -> vector<256x16xf32>
    %c0_15 = arith.constant 0 : index
    %c0_16 = arith.constant 0 : index
    %17 = vector.load %arg7[%c0_15, %c0_16] : memref<1x16xf32, #tpu.memory_space<vmem>>, vector<1x16xf32>
    %18 = vector.broadcast %17 : vector<1x16xf32> to vector<256x16xf32>
    %19 = arith.addf %16, %18 : vector<256x16xf32>
    %cst_17 = arith.constant 0.000000e+00 : f32
    %20 = vector.broadcast %cst_17 : f32 to vector<256x16xf32>
    %21 = arith.maximumf %19, %20 : vector<256x16xf32>
    %c0_18 = arith.constant 0 : index
    %c0_19 = arith.constant 0 : index
    %22 = vector.load %arg8[%c0_18, %c0_19] : memref<1x16xf32, #tpu.memory_space<vmem>>, vector<1x16xf32>
    %23 = vector.broadcast %22 : vector<1x16xf32> to vector<256x16xf32>
    %24 = arith.mulf %21, %23 : vector<256x16xf32>
    %cst_20 = arith.constant dense<0.000000e+00> : vector<256xf32>
    %25 = vector.multi_reduction <add>, %24, %cst_20 [1] : vector<256x16xf32> to vector<256xf32>
    %26 = vector.shape_cast %25 : vector<256xf32> to vector<256x1xf32>
    %c0_21 = arith.constant 0 : index
    %c0_22 = arith.constant 0 : index
    %27 = vector.load %arg9[%c0_21, %c0_22] : memref<1x1xf32, #tpu.memory_space<vmem>>, vector<1x1xf32>
    %28 = vector.broadcast %27 : vector<1x1xf32> to vector<256x1xf32>
    %29 = arith.addf %26, %28 : vector<256x1xf32>
    %30 = arith.negf %29 : vector<256x1xf32>
    %31 = math.exp %30 : vector<256x1xf32>
    %cst_23 = arith.constant 1.000000e+00 : f32
    %32 = vector.broadcast %cst_23 : f32 to vector<256x1xf32>
    %33 = arith.addf %32, %31 : vector<256x1xf32>
    %34 = arith.divf %32, %33 : vector<256x1xf32>
    %c0_24 = arith.constant 0 : index
    %c0_25 = arith.constant 0 : index
    %35 = vector.load %arg10[%c0_24, %c0_25] : memref<256x1xf32, #tpu.memory_space<vmem>>, vector<256x1xf32>
    tpu.vector_store %arg10[%c0_24, %c0_25], %34 {strides = array<i32>} : memref<256x1xf32, #tpu.memory_space<vmem>>, vector<256x1xf32>,
    return
  }
  func.func @transform_0(%arg0: i32) -> (i32, i32) {
    %c0_i32 = arith.constant 0 : i32
    %c0_i32_0 = arith.constant 0 : i32
    return %arg0, %c0_i32 : i32, i32
  }
  func.func @transform_1(%arg0: i32) -> (i32, i32) {
    %c0_i32 = arith.constant 0 : i32
    %c0_i32_0 = arith.constant 0 : i32
    %c0_i32_1 = arith.constant 0 : i32
    return %c0_i32, %c0_i32_0 : i32, i32
  }
  func.func @transform_2(%arg0: i32) -> (i32, i32) {
    %c0_i32 = arith.constant 0 : i32
    %c0_i32_0 = arith.constant 0 : i32
    %c0_i32_1 = arith.constant 0 : i32
    return %c0_i32, %c0_i32_0 : i32, i32
  }
  func.func @transform_3(%arg0: i32) -> (i32, i32) {
    %c0_i32 = arith.constant 0 : i32
    %c0_i32_0 = arith.constant 0 : i32
    %c0_i32_1 = arith.constant 0 : i32
    return %c0_i32, %c0_i32_0 : i32, i32
  }
  func.func @transform_4(%arg0: i32) -> (i32, i32) {
    %c0_i32 = arith.constant 0 : i32
    %c0_i32_0 = arith.constant 0 : i32
    %c0_i32_1 = arith.constant 0 : i32
    return %c0_i32, %c0_i32_0 : i32, i32
  }
  func.func @transform_5(%arg0: i32) -> (i32, i32) {
    %c0_i32 = arith.constant 0 : i32
    %c0_i32_0 = arith.constant 0 : i32
    %c0_i32_1 = arith.constant 0 : i32
    return %c0_i32, %c0_i32_0 : i32, i32
  }
  func.func @transform_6(%arg0: i32) -> (i32, i32) {
    %c0_i32 = arith.constant 0 : i32
    %c0_i32_0 = arith.constant 0 : i32
    %c0_i32_1 = arith.constant 0 : i32
    return %c0_i32, %c0_i32_0 : i32, i32
  }
  func.func @transform_7(%arg0: i32) -> (i32, i32) {
    %c0_i32 = arith.constant 0 : i32
    %c0_i32_0 = arith.constant 0 : i32
    %c0_i32_1 = arith.constant 0 : i32
    return %c0_i32, %c0_i32_0 : i32, i32
  }
  func.func @transform_8(%arg0: i32) -> (i32, i32) {
    %c0_i32 = arith.constant 0 : i32
    %c0_i32_0 = arith.constant 0 : i32
    %c0_i32_1 = arith.constant 0 : i32
    return %c0_i32, %c0_i32_0 : i32, i32
  }
  func.func @transform_9(%arg0: i32) -> (i32, i32) {
    %c0_i32 = arith.constant 0 : i32
    %c0_i32_0 = arith.constant 0 : i32
    return %arg0, %c0_i32 : i32, i32
  }
}

</mosaic_0001>

<bundles_post_ra>
// kernel: tpu_custom_call.1
= control target key start
LH: loop header
LB: loop body
LE: loop exit
PB: predicated region body
PF: predicated region fallthrough
CT: control target
= control target key end

     0   :  { %vm77_vm0 = vcmask 261120   ;;  %vm446_vm1 = vcmask 523264   ;;  %vm1203_vm2 = vcmask 130048   ;;  %vm1531_vm3 = vcmask 7168   ;;  %s2769_s1 = inlined_call_operand.vmem [shape: f32[32,64], index: 1, kind: input, shape index: {}]   ;;  %s2770_s0 = inlined_call_operand.vmem [shape: f32[256,32], index: 0, kind: input, shape index: {}]   ;;  %s2771_s3 = inlined_call_operand.vmem [shape: f32[64,32], index: 3, kind: input, shape index: {}]   ;;  %s2772_s5 = inlined_call_operand.vmem [shape: f32[32,16], index: 5, kind: input, shape index: {}]   ;;  %s2773_s2 = inlined_call_operand.vmem [shape: f32[1,64], index: 2, kind: input, shape index: {}]   ;;  %s2774_s4 = inlined_call_operand.vmem [shape: f32[1,32], index: 4, kind: input, shape index: {}]   ;;  %s2775_s8 = inlined_call_operand.<no memory space> [shape: f32[1,1], index: 8, kind: input, shape index: {}]   ;;  %s2776_s6 = inlined_call_operand.vmem [shape: f32[1,16], index: 6, kind: input, shape index: {}]   ;;  %s2777_s7 = inlined_call_operand.vmem [shape: f32[1,16], index: 7, kind: input, shape index: {}]   ;;  %s2778_s9 = inlined_call_operand.vmem [shape: f32[256,1], index: 9, kind: output, shape index: {}]  }
   0x1   :  { %v69_v0 = vld [vmem:[%s2769_s1 + $0x18] sm:$0xff]  ;;  %v68_v1 = vld [vmem:[%s2769_s1 + $0x10] sm:$0xff]  ;;  %v34_v2 = vld [vmem:[%s2770_s0] sm:$0xff] }
   0x2   :  { %1813 = vmatprep.subr.mxu0 %v69_v0  ;;  %1989 = vmatprep.subr.mxu1 %v69_v0  ;;  %v67_v3 = vld [vmem:[%s2769_s1 + $0x8] sm:$0xff]  ;;  %v66_v4 = vld [vmem:[%s2769_s1] sm:$0xff]  ;;  %v36_v6 = vld [vmem:[%s2770_s0 + $0x10] sm:$0xff] }
   0x3   :  { %1814 = vmatpush3.msra.mxu0 %v69_v0  ;;  %1821 = vmatprep.mubr.msk.f32.mxu0 %vm77_vm0, %v34_v2  ;;  %v35_v5 = vld [vmem:[%s2770_s0 + $0x8] sm:$0xff]  ;;  %v50_v7 = vld [vmem:[%s2770_s0 + $0x80] sm:$0xff]  ;;  %v52_v9 = vld [vmem:[%s2770_s0 + $0x90] sm:$0xff] }
   0x4   :  { %1815 = vmatprep.subr.mxu0 %v68_v1  ;;  %1993 = vmatpush3.msra.mxu1 %v69_v0  ;;  %v51_v8 = vld [vmem:[%s2770_s0 + $0x88] sm:$0xff]  ;;  %v37_v10 = vld [vmem:[%s2770_s0 + $0x18] sm:$0xff]  ;;  %v38_v11 = vld [vmem:[%s2770_s0 + $0x20] sm:$0xff] }
   0x5   :  { %1816 = vmatpush3.msra.mxu0 %v68_v1  ;;  %1990 = vmatprep.subr.mxu1 %v68_v1  ;;  %v53_v12 = vld [vmem:[%s2770_s0 + $0x98] sm:$0xff]  ;;  %v437_v14 = vld [vmem:[%s2771_s3 + $0x30] sm:$0xff]  ;;  %v54_v15 = vld [vmem:[%s2770_s0 + $0xa0] sm:$0xff] }
   0x6   :  { %1817 = vmatprep.subr.mxu0 %v67_v3  ;;  %1994 = vmatpush3.msra.mxu1 %v68_v1  ;;  %v438_v13 = vld [vmem:[%s2771_s3 + $0x38] sm:$0xff]  ;;  %v39_v16 = vld [vmem:[%s2770_s0 + $0x28] sm:$0xff]  ;;  %v40_v18 = vld [vmem:[%s2770_s0 + $0x30] sm:$0xff] }
   0x7   :  { %1818 = vmatpush3.msra.mxu0 %v67_v3  ;;  %1991 = vmatprep.subr.mxu1 %v67_v3  ;;  %v436_v17 = vld [vmem:[%s2771_s3 + $0x28] sm:$0xff]  ;;  %v435_v20 = vld [vmem:[%s2771_s3 + $0x20] sm:$0xff]  ;;  %v56_v21 = vld [vmem:[%s2770_s0 + $0xb0] sm:$0xff] }
   0x8   :  { %1819 = vmatprep.subr.mxu0 %v66_v4  ;;  %1995 = vmatpush3.msra.mxu1 %v67_v3  ;;  %v55_v19 = vld [vmem:[%s2770_s0 + $0xa8] sm:$0xff]  ;;  %v41_v22 = vld [vmem:[%s2770_s0 + $0x38] sm:$0xff]  ;;  %v42_v24 = vld [vmem:[%s2770_s0 + $0x40] sm:$0xff] }
   0x9   :  { %1820 = vmatpush3.msra.mxu0 %v66_v4  ;;  %1992 = vmatprep.subr.mxu1 %v66_v4  ;;  %v434_v23 = vld [vmem:[%s2771_s3 + $0x18] sm:$0xff]  ;;  %v433_v26 = vld [vmem:[%s2771_s3 + $0x10] sm:$0xff]  ;;  %v58_v27 = vld [vmem:[%s2770_s0 + $0xc0] sm:$0xff] }
   0xa   :  { %1822 = vmatmul.mubr.msk.f32.vlgmr.msra.gmra.mxu0 %vm77_vm0, %v35_v5  ;;  %1996 = vmatpush3.msra.mxu1 %v66_v4  ;;  %v57_v25 = vld [vmem:[%s2770_s0 + $0xb8] sm:$0xff]  ;;  %v43_v28 = vld [vmem:[%s2770_s0 + $0x48] sm:$0xff]  ;;  %v44_v30 = vld [vmem:[%s2770_s0 + $0x50] sm:$0xff] }
   0xb   :  { %1824 = vmatprep.mubr.msk.f32.mxu0 %vm77_vm0, %v36_v6  ;;  %1845 = vmatprep.mubr.msk.f32.mxu1 %vm77_vm0, %v50_v7  ;;  %v432_v29 = vld [vmem:[%s2771_s3 + $0x8] sm:$0xff]  ;;  %v60_v32 = vld [vmem:[%s2770_s0 + $0xd0] sm:$0xff]  ;;  %v45_v33 = vld [vmem:[%s2770_s0 + $0x58] sm:$0xff] }
   0xc   :  { %1846 = vmatmul.mubr.msk.f32.vlgmr.msra.gmra.mxu1 %vm77_vm0, %v51_v8  ;;  %1869 = vmatprep.subr.mxu1 %v438_v13  ;;  %v59_v31 = vld [vmem:[%s2770_s0 + $0xc8] sm:$0xff]  ;;  %v46_v34 = vld [vmem:[%s2770_s0 + $0x60] sm:$0xff]  ;;  %v61_v35 = vld [vmem:[%s2770_s0 + $0xd8] sm:$0xff] }
   0xd   :  { %1848 = vmatprep.mubr.msk.f32.mxu1 %vm77_vm0, %v52_v9  ;;  %1870 = vmatpush3.msra.mxu1 %v438_v13  ;;  %v62_v36 = vld [vmem:[%s2770_s0 + $0xe0] sm:$0xff]  ;;  %v47_v37 = vld [vmem:[%s2770_s0 + $0x68] sm:$0xff]  ;;  %v48_v38 = vld [vmem:[%s2770_s0 + $0x70] sm:$0xff] }
   0xe   :  { %1825 = vmatmul.mubr.msk.f32.gmra.mxu0 %vm77_vm0, %v37_v10  ;;  %1871 = vmatprep.subr.mxu1 %v437_v14  ;;  %v63_v39 = vld [vmem:[%s2770_s0 + $0xe8] sm:$0xff]  ;;  %v64_v40 = vld [vmem:[%s2770_s0 + $0xf0] sm:$0xff]  ;;  %v49_v41 = vld [vmem:[%s2770_s0 + $0x78] sm:$0xff] }
   0xf   :  { %1827 = vmatprep.mubr.msk.f32.mxu0 %vm77_vm0, %v38_v11  ;;  %1872 = vmatpush3.msra.mxu1 %v437_v14  ;;  %v65_v42 = vld [vmem:[%s2770_s0 + $0xf8] sm:$0xff]  ;;  %v431_v43 = vld [vmem:[%s2771_s3] sm:$0xff]  ;;  %v802_v45 = vld [vmem:[%s2772_s5 + $0x10] sm:$0xff] }
  0x10   :  { %1849 = vmatmul.mubr.msk.f32.gmra.mxu1 %vm77_vm0, %v53_v12  ;;  %1873 = vmatprep.subr.mxu1 %v436_v17  ;;  %v803_v44 = vld [vmem:[%s2772_s5 + $0x18] sm:$0xff]  ;;  %v801_v46 = vld [vmem:[%s2772_s5 + $0x8] sm:$0xff]  ;;  %v800_v47 = vld [vmem:[%s2772_s5] sm:$0xff] }
  0x11   :  { %1851 = vmatprep.mubr.msk.f32.mxu1 %vm77_vm0, %v54_v15  ;;  %1874 = vmatpush3.msra.mxu1 %v436_v17  ;;  %v2354_v48 = vld [vmem:[%s2773_s2] ss:$0 sm:$0xff] }
  0x12   :  { %1828 = vmatmul.mubr.msk.f32.gmra.mxu0 %vm77_vm0, %v39_v16  ;;  %1875 = vmatprep.subr.mxu1 %v435_v20 }
  0x13   :  { %1830 = vmatprep.mubr.msk.f32.mxu0 %vm77_vm0, %v40_v18  ;;  %1876 = vmatpush3.msra.mxu1 %v435_v20 }
  0x14   :  { %1852 = vmatmul.mubr.msk.f32.gmra.mxu1 %vm77_vm0, %v55_v19  ;;  %1877 = vmatprep.subr.mxu1 %v434_v23 }
  0x15   :  { %1854 = vmatprep.mubr.msk.f32.mxu1 %vm77_vm0, %v56_v21  ;;  %1878 = vmatpush3.msra.mxu1 %v434_v23 }
  0x16   :  { %1831 = vmatmul.mubr.msk.f32.gmra.mxu0 %vm77_vm0, %v41_v22  ;;  %1879 = vmatprep.subr.mxu1 %v433_v26 }
  0x17   :  { %1833 = vmatprep.mubr.msk.f32.mxu0 %vm77_vm0, %v42_v24  ;;  %1880 = vmatpush3.msra.mxu1 %v433_v26 }
  0x18   :  { %1855 = vmatmul.mubr.msk.f32.gmra.mxu1 %vm77_vm0, %v57_v25  ;;  %1881 = vmatprep.subr.mxu1 %v432_v29 }
  0x19   :  { %1857 = vmatprep.mubr.msk.f32.mxu1 %vm77_vm0, %v58_v27  ;;  %1882 = vmatpush3.msra.mxu1 %v432_v29 }
  0x1a   :  { %1834 = vmatmul.mubr.msk.f32.gmra.mxu0 %vm77_vm0, %v43_v28  ;;  %1883 = vmatprep.subr.mxu1 %v431_v43 }
  0x1b   :  { %1836 = vmatprep.mubr.msk.f32.mxu0 %vm77_vm0, %v44_v30  ;;  %1884 = vmatpush3.msra.mxu1 %v431_v43 }
  0x1c   :  { %1858 = vmatmul.mubr.msk.f32.gmra.mxu1 %vm77_vm0, %v59_v31  ;;  %1933 = vmatprep.subr.mxu0 %v803_v44 }
  0x1d   :  { %1860 = vmatprep.mubr.msk.f32.mxu1 %vm77_vm0, %v60_v32  ;;  %1934 = vmatpush3.msra.mxu0 %v803_v44 }
  0x1e   :  { %1837 = vmatmul.mubr.msk.f32.gmra.mxu0 %vm77_vm0, %v45_v33  ;;  %1935 = vmatprep.subr.mxu0 %v802_v45 }
  0x1f   :  { %1839 = vmatprep.mubr.msk.f32.mxu0 %vm77_vm0, %v46_v34  ;;  %1936 = vmatpush3.msra.mxu0 %v802_v45 }
  0x20   :  { %1861 = vmatmul.mubr.msk.f32.gmra.mxu1 %vm77_vm0, %v61_v35  ;;  %1937 = vmatprep.subr.mxu0 %v801_v46 }
  0x21   :  { %1863 = vmatprep.mubr.msk.f32.mxu1 %vm77_vm0, %v62_v36  ;;  %1938 = vmatpush3.msra.mxu0 %v801_v46 }
  0x22   :  { %1840 = vmatmul.mubr.msk.f32.gmra.mxu0 %vm77_vm0, %v47_v37  ;;  %1939 = vmatprep.subr.mxu0 %v800_v47 }
  0x23   :  { %1842 = vmatprep.mubr.msk.f32.mxu0 %vm77_vm0, %v48_v38  ;;  %1940 = vmatpush3.msra.mxu0 %v800_v47 }
  0x24   :  { %1864 = vmatmul.mubr.msk.f32.gmra.mxu1 %vm77_vm0, %v63_v39 }
  0x25   :  { %1866 = vmatprep.mubr.msk.f32.mxu1 %vm77_vm0, %v64_v40 }
  0x26   :  { %1843 = vmatmul.mubr.msk.f32.gmra.mxu0 %vm77_vm0, %v49_v41 }
  0x28   :  { %1867 = vmatmul.mubr.msk.f32.gmra.mxu1 %vm77_vm0, %v65_v42 }
  0xca   :  { %v1823_v49 = vpop.f32.mrf.mxu0 }
  0xcb   :  { %v246_v50 = vadd.f32 %v1823_v49, %v2354_v48 }
  0xcc   :  { %v240_v51 = vpop.f32.mrf.mxu0  ;;  %v2357_v52 = vpop.f32.mrf.mxu1 }
  0xcd   :  { %v241_v53 = vadd.f32 %v2354_v48, %v240_v51  ;;  %v400_v57 = vmax.f32 %v246_v50, 0.0  ;;  %v326_v43 = vadd.f32 %v2357_v52, %v2354_v48 }
  0xce   :  { %v1826_v54 = vpop.f32.mrf.mxu0  ;;  %v320_v55 = vpop.f32.mrf.mxu1 }
  0xcf   :  { %v399_v56 = vmax.f32 %v241_v53, 0.0  ;;  %v256_v58 = vadd.f32 %v1826_v54, %v2354_v48  ;;  %v321_v38 = vadd.f32 %v2354_v48, %v320_v55  ;;  %v416_v49 = vmax.f32 %v326_v43, 0.0 }
  0xd0   :  { %v250_v59 = vpop.f32.mrf.mxu0  ;;  %v2361_v60 = vpop.f32.mrf.mxu1 }
  0xd1   :  { %v251_v61 = vadd.f32 %v2354_v48, %v250_v59  ;;  %1885 = vmatprep.mubr.msk.f32.mxu1 %vm446_vm1, %v399_v56  ;;  %v402_v2 = vmax.f32 %v256_v58, 0.0  ;;  %v415_v45 = vmax.f32 %v321_v38, 0.0  ;;  %v336_v50 = vadd.f32 %v2361_v60, %v2354_v48 }
  0xd2   :  { %v1829_v62 = vpop.f32.mrf.mxu0  ;;  %1886 = vmatmul.mubr.msk.f32.vlgmr.msra.gmra.mxu1 %vm446_vm1, %v400_v57  ;;  %v330_v63 = vpop.f32.mrf.mxu1 }
  0xd3   :  { %v401_v0 = vmax.f32 %v251_v61, 0.0  ;;  %v266_v1 = vadd.f32 %v1829_v62, %v2354_v48  ;;  %v331_v46 = vadd.f32 %v2354_v48, %v330_v63  ;;  %v418_v54 = vmax.f32 %v336_v50, 0.0 }
  0xd4   :  { %v260_v3 = vpop.f32.mrf.mxu0  ;;  %v2367_v4 = vpop.f32.mrf.mxu1 }
  0xd5   :  { %v261_v5 = vadd.f32 %v2354_v48, %v260_v3  ;;  %1888 = vmatprep.mubr.msk.f32.mxu1 %vm446_vm1, %v401_v0  ;;  %v404_v6 = vmax.f32 %v266_v1, 0.0  ;;  %v417_v51 = vmax.f32 %v331_v46, 0.0  ;;  %v346_v55 = vadd.f32 %v2367_v4, %v2354_v48 }
  0xd6   :  { %v1832_v7 = vpop.f32.mrf.mxu0  ;;  %1889 = vmatmul.mubr.msk.f32.gmra.mxu1 %vm446_vm1, %v402_v2  ;;  %v340_v11 = vpop.f32.mrf.mxu1 }
  0xd7   :  { %v403_v8 = vmax.f32 %v261_v5, 0.0  ;;  %v276_v9 = vadd.f32 %v1832_v7, %v2354_v48  ;;  %v341_v52 = vadd.f32 %v2354_v48, %v340_v11  ;;  %v420_v59 = vmax.f32 %v346_v55, 0.0 }
  0xd8   :  { %v270_v10 = vpop.f32.mrf.mxu0  ;;  %v1856_v18 = vpop.f32.mrf.mxu1 }
  0xd9   :  { %v271_v12 = vadd.f32 %v2354_v48, %v270_v10  ;;  %1891 = vmatprep.mubr.msk.f32.mxu1 %vm446_vm1, %v403_v8  ;;  %v406_v13 = vmax.f32 %v276_v9, 0.0  ;;  %v419_v56 = vmax.f32 %v341_v52, 0.0  ;;  %v356_v60 = vadd.f32 %v1856_v18, %v2354_v48  ;;  %v2432_v18 = vld [vmem:[%s2774_s4] ss:$0 sm:$0xff] }
  0xda   :  { %v1835_v14 = vpop.f32.mrf.mxu0  ;;  %1892 = vmatmul.mubr.msk.f32.gmra.mxu1 %vm446_vm1, %v404_v6  ;;  %v350_v25 = vpop.f32.mrf.mxu1 }
  0xdb   :  { %v405_v15 = vmax.f32 %v271_v12, 0.0  ;;  %v286_v16 = vadd.f32 %v1835_v14, %v2354_v48  ;;  %v351_v57 = vadd.f32 %v2354_v48, %v350_v25  ;;  %v422_v0 = vmax.f32 %v356_v60, 0.0 }
  0xdc   :  { %v280_v17 = vpop.f32.mrf.mxu0  ;;  %v1859_v32 = vpop.f32.mrf.mxu1 }
  0xdd   :  { %v281_v19 = vadd.f32 %v2354_v48, %v280_v17  ;;  %1894 = vmatprep.mubr.msk.f32.mxu1 %vm446_vm1, %v405_v15  ;;  %v408_v20 = vmax.f32 %v286_v16, 0.0  ;;  %v421_v61 = vmax.f32 %v351_v57, 0.0  ;;  %v366_v1 = vadd.f32 %v1859_v32, %v2354_v48 }
  0xde   :  { %v1838_v21 = vpop.f32.mrf.mxu0  ;;  %1895 = vmatmul.mubr.msk.f32.gmra.mxu1 %vm446_vm1, %v406_v13  ;;  %v360_v40 = vpop.f32.mrf.mxu1 }
  0xdf   :  { %v407_v22 = vmax.f32 %v281_v19, 0.0  ;;  %v296_v23 = vadd.f32 %v1838_v21, %v2354_v48  ;;  %v361_v62 = vadd.f32 %v2354_v48, %v360_v40  ;;  %v424_v5 = vmax.f32 %v366_v1, 0.0 }
  0xe0   :  { %v290_v24 = vpop.f32.mrf.mxu0  ;;  %v1862_v47 = vpop.f32.mrf.mxu1 }
  0xe1   :  { %v291_v26 = vadd.f32 %v2354_v48, %v290_v24  ;;  %1897 = vmatprep.mubr.msk.f32.mxu1 %vm446_vm1, %v407_v22  ;;  %v410_v27 = vmax.f32 %v296_v23, 0.0  ;;  %v423_v2 = vmax.f32 %v361_v62, 0.0  ;;  %v376_v6 = vadd.f32 %v1862_v47, %v2354_v48 }
  0xe2   :  { %v1841_v28 = vpop.f32.mrf.mxu0  ;;  %1898 = vmatmul.mubr.msk.f32.gmra.mxu1 %vm446_vm1, %v408_v20  ;;  %v370_v53 = vpop.f32.mrf.mxu1 }
  0xe3   :  { %v409_v29 = vmax.f32 %v291_v26, 0.0  ;;  %v306_v30 = vadd.f32 %v1841_v28, %v2354_v48  ;;  %v371_v3 = vadd.f32 %v2354_v48, %v370_v53  ;;  %v426_v10 = vmax.f32 %v376_v6, 0.0 }
  0xe4   :  { %v300_v31 = vpop.f32.mrf.mxu0  ;;  %v1865_v58 = vpop.f32.mrf.mxu1 }
  0xe5   :  { %v301_v33 = vadd.f32 %v2354_v48, %v300_v31  ;;  %1900 = vmatprep.mubr.msk.f32.mxu1 %vm446_vm1, %v409_v29  ;;  %v412_v34 = vmax.f32 %v306_v30, 0.0  ;;  %v425_v7 = vmax.f32 %v371_v3, 0.0  ;;  %v386_v11 = vadd.f32 %v1865_v58, %v2354_v48 }
  0xe6   :  { %v1844_v35 = vpop.f32.mrf.mxu0  ;;  %1901 = vmatmul.mubr.msk.f32.gmra.mxu1 %vm446_vm1, %v410_v27  ;;  %v380_v63 = vpop.f32.mrf.mxu1 }
  0xe7   :  { %v411_v36 = vmax.f32 %v301_v33, 0.0  ;;  %v316_v37 = vadd.f32 %v1844_v35, %v2354_v48  ;;  %v381_v8 = vadd.f32 %v2354_v48, %v380_v63  ;;  %v428_v14 = vmax.f32 %v386_v11, 0.0 }
  0xe8   :  { %v310_v39 = vpop.f32.mrf.mxu0  ;;  %v1868_v4 = vpop.f32.mrf.mxu1 }
  0xe9   :  { %v311_v41 = vadd.f32 %v2354_v48, %v310_v39  ;;  %1903 = vmatprep.mubr.msk.f32.mxu1 %vm446_vm1, %v411_v36  ;;  %v414_v42 = vmax.f32 %v316_v37, 0.0  ;;  %v427_v12 = vmax.f32 %v381_v8, 0.0  ;;  %v396_v15 = vadd.f32 %v1868_v4, %v2354_v48 }
  0xea   :  { %1904 = vmatmul.mubr.msk.f32.gmra.mxu1 %vm446_vm1, %v412_v34  ;;  %v390_v9 = vpop.f32.mrf.mxu1 }
  0xeb   :  { %v413_v44 = vmax.f32 %v311_v41, 0.0  ;;  %v391_v13 = vadd.f32 %v2354_v48, %v390_v9  ;;  %v430_v17 = vmax.f32 %v396_v15, 0.0 }
  0xed   :  { %1906 = vmatprep.mubr.msk.f32.mxu1 %vm446_vm1, %v413_v44  ;;  %v429_v16 = vmax.f32 %v391_v13, 0.0 }
  0xee   :  { %1907 = vmatmul.mubr.msk.f32.gmra.mxu1 %vm446_vm1, %v414_v42 }
  0xef   :  { %1909 = vmatprep.mubr.msk.f32.mxu1 %vm446_vm1, %v415_v45 }
  0xf2   :  { %1910 = vmatmul.mubr.msk.f32.gmra.mxu1 %vm446_vm1, %v416_v49 }
  0xf3   :  { %1912 = vmatprep.mubr.msk.f32.mxu1 %vm446_vm1, %v417_v51 }
  0xf6   :  { %1913 = vmatmul.mubr.msk.f32.gmra.mxu1 %vm446_vm1, %v418_v54 }
  0xf7   :  { %1915 = vmatprep.mubr.msk.f32.mxu1 %vm446_vm1, %v419_v56 }
  0xfa   :  { %1916 = vmatmul.mubr.msk.f32.gmra.mxu1 %vm446_vm1, %v420_v59 }
  0xfb   :  { %1918 = vmatprep.mubr.msk.f32.mxu1 %vm446_vm1, %v421_v61 }
  0xfe   :  { %1919 = vmatmul.mubr.msk.f32.gmra.mxu1 %vm446_vm1, %v422_v0 }
  0xff   :  { %1921 = vmatprep.mubr.msk.f32.mxu1 %vm446_vm1, %v423_v2 }
 0x102   :  { %1922 = vmatmul.mubr.msk.f32.gmra.mxu1 %vm446_vm1, %v424_v5 }
 0x103   :  { %1924 = vmatprep.mubr.msk.f32.mxu1 %vm446_vm1, %v425_v7 }
 0x106   :  { %1925 = vmatmul.mubr.msk.f32.gmra.mxu1 %vm446_vm1, %v426_v10 }
 0x107   :  { %1927 = vmatprep.mubr.msk.f32.mxu1 %vm446_vm1, %v427_v12 }
 0x10a   :  { %1928 = vmatmul.mubr.msk.f32.gmra.mxu1 %vm446_vm1, %v428_v14 }
 0x10b   :  { %1930 = vmatprep.mubr.msk.f32.mxu1 %vm446_vm1, %v429_v16 }
 0x10e   :  { %1931 = vmatmul.mubr.msk.f32.gmra.mxu1 %vm446_vm1, %v430_v17 }
 0x192   :  { %v1887_v19 = vpop.f32.mrf.mxu1 }
 0x193   :  { %v615_v48 = vadd.f32 %v1887_v19, %v2432_v18 }
 0x194   :  { %v609_v20 = vpop.f32.mrf.mxu1 }
 0x195   :  { %v610_v21 = vadd.f32 %v2432_v18, %v609_v20  ;;  %v769_v24 = vmax.f32 %v615_v48, 0.0 }
 0x196   :  { %v1890_v22 = vpop.f32.mrf.mxu1 }
 0x197   :  { %v768_v23 = vmax.f32 %v610_v21, 0.0  ;;  %v625_v25 = vadd.f32 %v1890_v22, %v2432_v18 }
 0x198   :  { %v619_v26 = vpop.f32.mrf.mxu1 }
 0x199   :  { %v620_v27 = vadd.f32 %v2432_v18, %v619_v26  ;;  %1941 = vmatprep.mubr.msk.f32.mxu0 %vm77_vm0, %v768_v23  ;;  %v771_v30 = vmax.f32 %v625_v25, 0.0 }
 0x19a   :  { %v1893_v28 = vpop.f32.mrf.mxu1  ;;  %1942 = vmatmul.mubr.msk.f32.vlgmr.msra.gmra.mxu0 %vm77_vm0, %v769_v24 }
 0x19b   :  { %v770_v29 = vmax.f32 %v620_v27, 0.0  ;;  %v635_v31 = vadd.f32 %v1893_v28, %v2432_v18 }
 0x19c   :  { %v629_v32 = vpop.f32.mrf.mxu1 }
 0x19d   :  { %v630_v33 = vadd.f32 %v2432_v18, %v629_v32  ;;  %1944 = vmatprep.mubr.msk.f32.mxu0 %vm77_vm0, %v770_v29  ;;  %v773_v36 = vmax.f32 %v635_v31, 0.0 }
 0x19e   :  { %v1896_v34 = vpop.f32.mrf.mxu1  ;;  %1945 = vmatmul.mubr.msk.f32.gmra.mxu0 %vm77_vm0, %v771_v30 }
 0x19f   :  { %v772_v35 = vmax.f32 %v630_v33, 0.0  ;;  %v645_v37 = vadd.f32 %v1896_v34, %v2432_v18 }
 0x1a0   :  { %v639_v38 = vpop.f32.mrf.mxu1 }
 0x1a1   :  { %v640_v39 = vadd.f32 %v2432_v18, %v639_v38  ;;  %1947 = vmatprep.mubr.msk.f32.mxu0 %vm77_vm0, %v772_v35  ;;  %v775_v42 = vmax.f32 %v645_v37, 0.0 }
 0x1a2   :  { %v1899_v40 = vpop.f32.mrf.mxu1  ;;  %1948 = vmatmul.mubr.msk.f32.gmra.mxu0 %vm77_vm0, %v773_v36 }
 0x1a3   :  { %v774_v41 = vmax.f32 %v640_v39, 0.0  ;;  %v655_v43 = vadd.f32 %v1899_v40, %v2432_v18 }
 0x1a4   :  { %v649_v44 = vpop.f32.mrf.mxu1 }
 0x1a5   :  { %v650_v45 = vadd.f32 %v2432_v18, %v649_v44  ;;  %1950 = vmatprep.mubr.msk.f32.mxu0 %vm77_vm0, %v774_v41  ;;  %v777_v49 = vmax.f32 %v655_v43, 0.0 }
 0x1a6   :  { %v1902_v46 = vpop.f32.mrf.mxu1  ;;  %1951 = vmatmul.mubr.msk.f32.gmra.mxu0 %vm77_vm0, %v775_v42 }
 0x1a7   :  { %v776_v47 = vmax.f32 %v650_v45, 0.0  ;;  %v665_v50 = vadd.f32 %v1902_v46, %v2432_v18 }
 0x1a8   :  { %v659_v51 = vpop.f32.mrf.mxu1 }
 0x1a9   :  { %v660_v52 = vadd.f32 %v2432_v18, %v659_v51  ;;  %1953 = vmatprep.mubr.msk.f32.mxu0 %vm77_vm0, %v776_v47  ;;  %v779_v55 = vmax.f32 %v665_v50, 0.0 }
 0x1aa   :  { %v1905_v53 = vpop.f32.mrf.mxu1  ;;  %1954 = vmatmul.mubr.msk.f32.gmra.mxu0 %vm77_vm0, %v777_v49 }
 0x1ab   :  { %v778_v54 = vmax.f32 %v660_v52, 0.0  ;;  %v675_v56 = vadd.f32 %v1905_v53, %v2432_v18  ;;  %v14_v52 = vstv %s2775_s8  ;;  %v2504_v53 = vld [vmem:[%s2776_s6] ss:$0 sm:$0xff] }
 0x1ac   :  { %v669_v57 = vpop.f32.mrf.mxu1  ;;  %15 = vst [vmem:[#allocation2] sm:$0x1] %v14_v52 }
 0x1ad   :  { %v670_v58 = vadd.f32 %v2432_v18, %v669_v57  ;;  %1956 = vmatprep.mubr.msk.f32.mxu0 %vm77_vm0, %v778_v54  ;;  %v781_v61 = vmax.f32 %v675_v56, 0.0  ;;  %v2510_v56 = vld [vmem:[%s2777_s7] ss:$0 sm:$0xff] }
 0x1ae   :  { %v1908_v59 = vpop.f32.mrf.mxu1  ;;  %1957 = vmatmul.mubr.msk.f32.gmra.mxu0 %vm77_vm0, %v779_v55 }
 0x1af   :  { %v780_v60 = vmax.f32 %v670_v58, 0.0  ;;  %v685_v62 = vadd.f32 %v1908_v59, %v2432_v18 }
 0x1b0   :  { %v679_v63 = vpop.f32.mrf.mxu1 }
 0x1b1   :  { %v680_v0 = vadd.f32 %v2432_v18, %v679_v63  ;;  %1959 = vmatprep.mubr.msk.f32.mxu0 %vm77_vm0, %v780_v60  ;;  %v783_v3 = vmax.f32 %v685_v62, 0.0 }
 0x1b2   :  { %v1911_v1 = vpop.f32.mrf.mxu1  ;;  %1960 = vmatmul.mubr.msk.f32.gmra.mxu0 %vm77_vm0, %v781_v61 }
 0x1b3   :  { %v782_v2 = vmax.f32 %v680_v0, 0.0  ;;  %v695_v4 = vadd.f32 %v1911_v1, %v2432_v18 }
 0x1b4   :  { %v689_v5 = vpop.f32.mrf.mxu1 }
 0x1b5   :  { %v690_v6 = vadd.f32 %v2432_v18, %v689_v5  ;;  %1962 = vmatprep.mubr.msk.f32.mxu0 %vm77_vm0, %v782_v2  ;;  %v785_v9 = vmax.f32 %v695_v4, 0.0 }
 0x1b6   :  { %v1914_v7 = vpop.f32.mrf.mxu1  ;;  %1963 = vmatmul.mubr.msk.f32.gmra.mxu0 %vm77_vm0, %v783_v3 }
 0x1b7   :  { %v784_v8 = vmax.f32 %v690_v6, 0.0  ;;  %v705_v10 = vadd.f32 %v1914_v7, %v2432_v18 }
 0x1b8   :  { %v699_v11 = vpop.f32.mrf.mxu1 }
 0x1b9   :  { %v700_v12 = vadd.f32 %v2432_v18, %v699_v11  ;;  %1965 = vmatprep.mubr.msk.f32.mxu0 %vm77_vm0, %v784_v8  ;;  %v787_v15 = vmax.f32 %v705_v10, 0.0 }
 0x1ba   :  { %v1917_v13 = vpop.f32.mrf.mxu1  ;;  %1966 = vmatmul.mubr.msk.f32.gmra.mxu0 %vm77_vm0, %v785_v9 }
 0x1bb   :  { %v786_v14 = vmax.f32 %v700_v12, 0.0  ;;  %v715_v16 = vadd.f32 %v1917_v13, %v2432_v18 }
 0x1bc   :  { %v709_v17 = vpop.f32.mrf.mxu1 }
 0x1bd   :  { %v710_v19 = vadd.f32 %v2432_v18, %v709_v17  ;;  %1968 = vmatprep.mubr.msk.f32.mxu0 %vm77_vm0, %v786_v14  ;;  %v789_v21 = vmax.f32 %v715_v16, 0.0 }
 0x1be   :  { %v1920_v48 = vpop.f32.mrf.mxu1  ;;  %1969 = vmatmul.mubr.msk.f32.gmra.mxu0 %vm77_vm0, %v787_v15 }
 0x1bf   :  { %v788_v20 = vmax.f32 %v710_v19, 0.0  ;;  %v725_v22 = vadd.f32 %v1920_v48, %v2432_v18 }
 0x1c0   :  { %v719_v23 = vpop.f32.mrf.mxu1 }
 0x1c1   :  { %v720_v24 = vadd.f32 %v2432_v18, %v719_v23  ;;  %1971 = vmatprep.mubr.msk.f32.mxu0 %vm77_vm0, %v788_v20  ;;  %v791_v27 = vmax.f32 %v725_v22, 0.0 }
 0x1c2   :  { %v1923_v25 = vpop.f32.mrf.mxu1  ;;  %1972 = vmatmul.mubr.msk.f32.gmra.mxu0 %vm77_vm0, %v789_v21 }
 0x1c3   :  { %v790_v26 = vmax.f32 %v720_v24, 0.0  ;;  %v735_v28 = vadd.f32 %v1923_v25, %v2432_v18 }
 0x1c4   :  { %v729_v29 = vpop.f32.mrf.mxu1 }
 0x1c5   :  { %v730_v30 = vadd.f32 %v2432_v18, %v729_v29  ;;  %1974 = vmatprep.mubr.msk.f32.mxu0 %vm77_vm0, %v790_v26  ;;  %v793_v33 = vmax.f32 %v735_v28, 0.0 }
 0x1c6   :  { %v1926_v31 = vpop.f32.mrf.mxu1  ;;  %1975 = vmatmul.mubr.msk.f32.gmra.mxu0 %vm77_vm0, %v791_v27 }
 0x1c7   :  { %v792_v32 = vmax.f32 %v730_v30, 0.0  ;;  %v745_v34 = vadd.f32 %v1926_v31, %v2432_v18 }
 0x1c8   :  { %v739_v35 = vpop.f32.mrf.mxu1 }
 0x1c9   :  { %v740_v36 = vadd.f32 %v2432_v18, %v739_v35  ;;  %1977 = vmatprep.mubr.msk.f32.mxu0 %vm77_vm0, %v792_v32  ;;  %v795_v39 = vmax.f32 %v745_v34, 0.0 }
 0x1ca   :  { %v1929_v37 = vpop.f32.mrf.mxu1  ;;  %1978 = vmatmul.mubr.msk.f32.gmra.mxu0 %vm77_vm0, %v793_v33 }
 0x1cb   :  { %v794_v38 = vmax.f32 %v740_v36, 0.0  ;;  %v755_v40 = vadd.f32 %v1929_v37, %v2432_v18 }
 0x1cc   :  { %v749_v41 = vpop.f32.mrf.mxu1 }
 0x1cd   :  { %v750_v42 = vadd.f32 %v2432_v18, %v749_v41  ;;  %1980 = vmatprep.mubr.msk.f32.mxu0 %vm77_vm0, %v794_v38  ;;  %v797_v45 = vmax.f32 %v755_v40, 0.0 }
 0x1ce   :  { %v1932_v43 = vpop.f32.mrf.mxu1  ;;  %1981 = vmatmul.mubr.msk.f32.gmra.mxu0 %vm77_vm0, %v795_v39 }
 0x1cf   :  { %v796_v44 = vmax.f32 %v750_v42, 0.0  ;;  %v765_v46 = vadd.f32 %v1932_v43, %v2432_v18 }
 0x1d0   :  { %v759_v47 = vpop.f32.mrf.mxu1 }
 0x1d1   :  { %v760_v49 = vadd.f32 %v2432_v18, %v759_v47  ;;  %1983 = vmatprep.mubr.msk.f32.mxu0 %vm77_vm0, %v796_v44  ;;  %v799_v51 = vmax.f32 %v765_v46, 0.0 }
 0x1d2   :  { %1984 = vmatmul.mubr.msk.f32.gmra.mxu0 %vm77_vm0, %v797_v45 }
 0x1d3   :  { %v798_v50 = vmax.f32 %v760_v49, 0.0 }
 0x1d5   :  { %1986 = vmatprep.mubr.msk.f32.mxu0 %vm77_vm0, %v798_v50 }
 0x1d6   :  { %1987 = vmatmul.mubr.msk.f32.gmra.mxu0 %vm77_vm0, %v799_v51 }
 0x25a   :  { %v1943_v18 = vpop.f32.mrf.mxu0 }
 0x25b   :  { %v979_v54 = vadd.f32 %v1943_v18, %v2504_v53 }
 0x25c   :  { %v973_v55 = vpop.f32.mrf.mxu0 }
 0x25d   :  { %v1133_v57 = vmax.f32 %v979_v54, 0.0  ;;  %v974_v58 = vadd.f32 %v2504_v53, %v973_v55 }
 0x25e   :  { %v1946_v59 = vpop.f32.mrf.mxu0 }
 0x25f   :  { %v1132_v60 = vmax.f32 %v974_v58, 0.0  ;;  %v989_v61 = vadd.f32 %v1946_v59, %v2504_v53  ;;  %v1172_v62 = vmul.f32 %v2510_v56, %v1133_v57 }
 0x260   :  { %v983_v63 = vpop.f32.mrf.mxu0 }
 0x261   :  { %v1135_v0 = vmax.f32 %v989_v61, 0.0  ;;  %v984_v1 = vadd.f32 %v2504_v53, %v983_v63  ;;  %v1207_v2 = vsel %vm1203_vm2, %v1172_v62, 0.0  ;;  %v1171_v3 = vmul.f32 %v2510_v56, %v1132_v60 }
 0x262   :  { %1208 = vadd.xlane.f32.xlu0 %v1207_v2  ;;  %v1949_v4 = vpop.f32.mrf.mxu0 }
 0x263   :  { %v1134_v5 = vmax.f32 %v984_v1, 0.0  ;;  %v999_v6 = vadd.f32 %v1949_v4, %v2504_v53  ;;  %v1174_v7 = vmul.f32 %v2510_v56, %v1135_v0  ;;  %v1204_v9 = vsel %vm1203_vm2, %v1171_v3, 0.0 }
 0x264   :  { %v993_v8 = vpop.f32.mrf.mxu0 }
 0x265   :  { %v1137_v10 = vmax.f32 %v999_v6, 0.0  ;;  %v994_v11 = vadd.f32 %v2504_v53, %v993_v8  ;;  %v1213_v12 = vsel %vm1203_vm2, %v1174_v7, 0.0  ;;  %v1173_v13 = vmul.f32 %v2510_v56, %v1134_v5 }
 0x266   :  { %1214 = vadd.xlane.f32.xlu1 %v1213_v12  ;;  %v1952_v14 = vpop.f32.mrf.mxu0  ;;  %1205 = vadd.xlane.f32.xlu0 %v1204_v9 }
 0x267   :  { %v1136_v15 = vmax.f32 %v994_v11, 0.0  ;;  %v1009_v16 = vadd.f32 %v1952_v14, %v2504_v53  ;;  %v1210_v19 = vsel %vm1203_vm2, %v1173_v13, 0.0  ;;  %v1176_v22 = vmul.f32 %v2510_v56, %v1137_v10 }
 0x268   :  { %v1003_v17 = vpop.f32.mrf.mxu0 }
 0x269   :  { %v1139_v48 = vmax.f32 %v1009_v16, 0.0  ;;  %v1004_v20 = vadd.f32 %v2504_v53, %v1003_v17  ;;  %v1175_v21 = vmul.f32 %v2510_v56, %v1136_v15  ;;  %v1219_v31 = vsel %vm1203_vm2, %v1176_v22, 0.0 }
 0x26a   :  { %v1955_v23 = vpop.f32.mrf.mxu0  ;;  %1211 = vadd.xlane.f32.xlu1 %v1210_v19 }
 0x26b   :  { %v1138_v24 = vmax.f32 %v1004_v20, 0.0  ;;  %v1019_v25 = vadd.f32 %v1955_v23, %v2504_v53  ;;  %v1216_v26 = vsel %vm1203_vm2, %v1175_v21, 0.0  ;;  %v1178_v28 = vmul.f32 %v2510_v56, %v1139_v48 }
 0x26c   :  { %v1013_v27 = vpop.f32.mrf.mxu0  ;;  %1217 = vadd.xlane.f32.xlu0 %v1216_v26 }
 0x26d   :  { %v1141_v29 = vmax.f32 %v1019_v25, 0.0  ;;  %v1014_v30 = vadd.f32 %v2504_v53, %v1013_v27  ;;  %v1177_v32 = vmul.f32 %v2510_v56, %v1138_v24  ;;  %v1225_v38 = vsel %vm1203_vm2, %v1178_v28, 0.0 }
 0x26e   :  { %v1958_v33 = vpop.f32.mrf.mxu0  ;;  %1220 = vadd.xlane.f32.xlu1 %v1219_v31 }
 0x26f   :  { %v1140_v34 = vmax.f32 %v1014_v30, 0.0  ;;  %v1029_v35 = vadd.f32 %v1958_v33, %v2504_v53  ;;  %v1222_v36 = vsel %vm1203_vm2, %v1177_v32, 0.0  ;;  %v1180_v42 = vmul.f32 %v2510_v56, %v1141_v29 }
 0x270   :  { %v1023_v37 = vpop.f32.mrf.mxu0  ;;  %1223 = vadd.xlane.f32.xlu0 %v1222_v36 }
 0x271   :  { %v1143_v39 = vmax.f32 %v1029_v35, 0.0  ;;  %v1024_v40 = vadd.f32 %v2504_v53, %v1023_v37  ;;  %v1179_v41 = vmul.f32 %v2510_v56, %v1140_v34  ;;  %v1231_v52 = vsel %vm1203_vm2, %v1180_v42, 0.0 }
 0x272   :  { %v1961_v43 = vpop.f32.mrf.mxu0  ;;  %1226 = vadd.xlane.f32.xlu1 %v1225_v38 }
 0x273   :  { %v1142_v44 = vmax.f32 %v1024_v40, 0.0  ;;  %v1039_v45 = vadd.f32 %v1961_v43, %v2504_v53  ;;  %v1228_v46 = vsel %vm1203_vm2, %v1179_v41, 0.0  ;;  %v1182_v49 = vmul.f32 %v2510_v56, %v1143_v39 }
 0x274   :  { %v1033_v47 = vpop.f32.mrf.mxu0  ;;  %1229 = vadd.xlane.f32.xlu0 %v1228_v46 }
 0x275   :  { %v1145_v50 = vmax.f32 %v1039_v45, 0.0  ;;  %v1034_v51 = vadd.f32 %v2504_v53, %v1033_v47  ;;  %v1181_v18 = vmul.f32 %v2510_v56, %v1142_v44  ;;  %v1237_v60 = vsel %vm1203_vm2, %v1182_v49, 0.0 }
 0x276   :  { %v1964_v54 = vpop.f32.mrf.mxu0  ;;  %1232 = vadd.xlane.f32.xlu1 %v1231_v52 }
 0x277   :  { %v1144_v55 = vmax.f32 %v1034_v51, 0.0  ;;  %v1049_v57 = vadd.f32 %v1964_v54, %v2504_v53  ;;  %v1234_v58 = vsel %vm1203_vm2, %v1181_v18, 0.0  ;;  %v1184_v0 = vmul.f32 %v2510_v56, %v1145_v50 }
 0x278   :  { %v1043_v59 = vpop.f32.mrf.mxu0  ;;  %1235 = vadd.xlane.f32.xlu0 %v1234_v58 }
 0x279   :  { %v1147_v61 = vmax.f32 %v1049_v57, 0.0  ;;  %v1044_v62 = vadd.f32 %v2504_v53, %v1043_v59  ;;  %v1183_v63 = vmul.f32 %v2510_v56, %v1144_v55  ;;  %v1243_v9 = vsel %vm1203_vm2, %v1184_v0, 0.0 }
 0x27a   :  { %v1967_v1 = vpop.f32.mrf.mxu0  ;;  %1238 = vadd.xlane.f32.xlu1 %v1237_v60 }
 0x27b   :  { %v1146_v2 = vmax.f32 %v1044_v62, 0.0  ;;  %v1059_v3 = vadd.f32 %v1967_v1, %v2504_v53  ;;  %v1240_v4 = vsel %vm1203_vm2, %v1183_v63, 0.0  ;;  %v1186_v6 = vmul.f32 %v2510_v56, %v1147_v61 }
 0x27c   :  { %v1053_v5 = vpop.f32.mrf.mxu0  ;;  %1241 = vadd.xlane.f32.xlu0 %v1240_v4 }
 0x27d   :  { %v1149_v7 = vmax.f32 %v1059_v3, 0.0  ;;  %v1054_v8 = vadd.f32 %v2504_v53, %v1053_v5  ;;  %v1185_v10 = vmul.f32 %v2510_v56, %v1146_v2  ;;  %v1249_v16 = vsel %vm1203_vm2, %v1186_v6, 0.0 }
 0x27e   :  { %v1970_v11 = vpop.f32.mrf.mxu0  ;;  %1244 = vadd.xlane.f32.xlu1 %v1243_v9 }
 0x27f   :  { %v1148_v12 = vmax.f32 %v1054_v8, 0.0  ;;  %v1069_v13 = vadd.f32 %v1970_v11, %v2504_v53  ;;  %v1246_v14 = vsel %vm1203_vm2, %v1185_v10, 0.0  ;;  %v1188_v20 = vmul.f32 %v2510_v56, %v1149_v7 }
 0x280   :  { %v1063_v15 = vpop.f32.mrf.mxu0  ;;  %1247 = vadd.xlane.f32.xlu0 %v1246_v14 }
 0x281   :  { %v1151_v17 = vmax.f32 %v1069_v13, 0.0  ;;  %v1064_v19 = vadd.f32 %v2504_v53, %v1063_v15  ;;  %v1187_v48 = vmul.f32 %v2510_v56, %v1148_v12  ;;  %v1255_v29 = vsel %vm1203_vm2, %v1188_v20, 0.0 }
 0x282   :  { %v1973_v21 = vpop.f32.mrf.mxu0  ;;  %1250 = vadd.xlane.f32.xlu1 %v1249_v16 }
 0x283   :  { %v1150_v22 = vmax.f32 %v1064_v19, 0.0  ;;  %v1079_v23 = vadd.f32 %v1973_v21, %v2504_v53  ;;  %v1252_v24 = vsel %vm1203_vm2, %v1187_v48, 0.0  ;;  %v1190_v26 = vmul.f32 %v2510_v56, %v1151_v17 }
 0x284   :  { %v1073_v25 = vpop.f32.mrf.mxu0  ;;  %1253 = vadd.xlane.f32.xlu0 %v1252_v24 }
 0x285   :  { %v1153_v27 = vmax.f32 %v1079_v23, 0.0  ;;  %v1074_v28 = vadd.f32 %v2504_v53, %v1073_v25  ;;  %v1189_v30 = vmul.f32 %v2510_v56, %v1150_v22  ;;  %v1261_v36 = vsel %vm1203_vm2, %v1190_v26, 0.0  ;;  %v2607_v25 = vld [vmem:[#allocation2] ss:$0 sm:$0xff] }
 0x286   :  { %v1976_v31 = vpop.f32.mrf.mxu0  ;;  %1256 = vadd.xlane.f32.xlu1 %v1255_v29 }
 0x287   :  { %v1152_v32 = vmax.f32 %v1074_v28, 0.0  ;;  %v1089_v33 = vadd.f32 %v1976_v31, %v2504_v53  ;;  %v1258_v34 = vsel %vm1203_vm2, %v1189_v30, 0.0  ;;  %v1192_v40 = vmul.f32 %v2510_v56, %v1153_v27 }
 0x288   :  { %v1083_v35 = vpop.f32.mrf.mxu0  ;;  %1259 = vadd.xlane.f32.xlu0 %v1258_v34 }
 0x289   :  { %v1155_v37 = vmax.f32 %v1089_v33, 0.0  ;;  %v1084_v38 = vadd.f32 %v2504_v53, %v1083_v35  ;;  %v1191_v39 = vmul.f32 %v2510_v56, %v1152_v32  ;;  %v1267_v50 = vsel %vm1203_vm2, %v1192_v40, 0.0 }
 0x28a   :  { %v1979_v41 = vpop.f32.mrf.mxu0  ;;  %1262 = vadd.xlane.f32.xlu1 %v1261_v36 }
 0x28b   :  { %v1154_v42 = vmax.f32 %v1084_v38, 0.0  ;;  %v1099_v43 = vadd.f32 %v1979_v41, %v2504_v53  ;;  %v1264_v44 = vsel %vm1203_vm2, %v1191_v39, 0.0  ;;  %v1194_v46 = vmul.f32 %v2510_v56, %v1155_v37 }
 0x28c   :  { %v1093_v45 = vpop.f32.mrf.mxu0  ;;  %1265 = vadd.xlane.f32.xlu0 %v1264_v44 }
 0x28d   :  { %v1157_v47 = vmax.f32 %v1099_v43, 0.0  ;;  %v1094_v49 = vadd.f32 %v2504_v53, %v1093_v45  ;;  %v1193_v51 = vmul.f32 %v2510_v56, %v1154_v42  ;;  %v1273_v58 = vsel %vm1203_vm2, %v1194_v46, 0.0 }
 0x28e   :  { %v1982_v52 = vpop.f32.mrf.mxu0  ;;  %1268 = vadd.xlane.f32.xlu1 %v1267_v50 }
 0x28f   :  { %v1156_v18 = vmax.f32 %v1094_v49, 0.0  ;;  %v1109_v54 = vadd.f32 %v1982_v52, %v2504_v53  ;;  %v1270_v55 = vsel %vm1203_vm2, %v1193_v51, 0.0  ;;  %v1196_v62 = vmul.f32 %v2510_v56, %v1157_v47 }
 0x290   :  { %v1103_v57 = vpop.f32.mrf.mxu0  ;;  %1271 = vadd.xlane.f32.xlu0 %v1270_v55 }
 0x291   :  { %v1159_v59 = vmax.f32 %v1109_v54, 0.0  ;;  %v1104_v60 = vadd.f32 %v2504_v53, %v1103_v57  ;;  %v1195_v61 = vmul.f32 %v2510_v56, %v1156_v18  ;;  %v1279_v7 = vsel %vm1203_vm2, %v1196_v62, 0.0 }
 0x292   :  { %v1985_v63 = vpop.f32.mrf.mxu0  ;;  %1274 = vadd.xlane.f32.xlu1 %v1273_v58 }
 0x293   :  { %v1158_v0 = vmax.f32 %v1104_v60, 0.0  ;;  %v1119_v1 = vadd.f32 %v1985_v63, %v2504_v53  ;;  %v1276_v2 = vsel %vm1203_vm2, %v1195_v61, 0.0  ;;  %v1198_v4 = vmul.f32 %v2510_v56, %v1159_v59 }
 0x294   :  { %v1113_v3 = vpop.f32.mrf.mxu0  ;;  %1277 = vadd.xlane.f32.xlu0 %v1276_v2 }
 0x295   :  { %v1161_v5 = vmax.f32 %v1119_v1, 0.0  ;;  %v1114_v6 = vadd.f32 %v2504_v53, %v1113_v3  ;;  %v1197_v8 = vmul.f32 %v2510_v56, %v1158_v0  ;;  %v1285_v14 = vsel %vm1203_vm2, %v1198_v4, 0.0 }
 0x296   :  { %v1988_v9 = vpop.f32.mrf.mxu0  ;;  %1280 = vadd.xlane.f32.xlu1 %v1279_v7 }
 0x297   :  { %v1160_v10 = vmax.f32 %v1114_v6, 0.0  ;;  %v1129_v11 = vadd.f32 %v1988_v9, %v2504_v53  ;;  %v1282_v12 = vsel %vm1203_vm2, %v1197_v8, 0.0  ;;  %v1200_v19 = vmul.f32 %v2510_v56, %v1161_v5 }
 0x298   :  { %v1123_v13 = vpop.f32.mrf.mxu0  ;;  %1283 = vadd.xlane.f32.xlu0 %v1282_v12 }
 0x299   :  { %v1163_v15 = vmax.f32 %v1129_v11, 0.0  ;;  %v1124_v16 = vadd.f32 %v2504_v53, %v1123_v13  ;;  %v1199_v17 = vmul.f32 %v2510_v56, %v1160_v10  ;;  %v1291_v22 = vsel %vm1203_vm2, %v1200_v19, 0.0 }
 0x29a   :  { %1286 = vadd.xlane.f32.xlu1 %v1285_v14 }
 0x29b   :  { %v1162_v48 = vmax.f32 %v1124_v16, 0.0  ;;  %v1288_v20 = vsel %vm1203_vm2, %v1199_v17, 0.0  ;;  %v1202_v21 = vmul.f32 %v2510_v56, %v1163_v15 }
 0x29c   :  { %1289 = vadd.xlane.f32.xlu0 %v1288_v20 }
 0x29d   :  { %v1201_v23 = vmul.f32 %v2510_v56, %v1162_v48  ;;  %v1297_v24 = vsel %vm1203_vm2, %v1202_v21, 0.0 }
 0x29e   :  { %1292 = vadd.xlane.f32.xlu1 %v1291_v22 }
 0x29f   :  { %v1294_v53 = vsel %vm1203_vm2, %v1201_v23, 0.0 }
 0x2a0   :  { %1295 = vadd.xlane.f32.xlu0 %v1294_v53 }
 0x2a2   :  { %1298 = vadd.xlane.f32.xlu1 %v1297_v24 }
 0x2eb   :  { %v1209_v26 = vpop.xlane.xlu0 %1208 }
 0x2ec   :  { %v1308_v27 = vadd.f32 %v2607_v25, %v1209_v26 }
 0x2ee   :  { %v1670_v28 = vmul.f32 -1.442695, %v1308_v27 }
 0x2ef   :  { %v1215_v29 = vpop.xlane.xlu1 %1214  ;;  %v1206_v30 = vpop.xlane.xlu0 %1205 }
 0x2f0   :  { %1997 = vpow2.f32 %v1670_v28  ;;  %v1310_v31 = vadd.f32 %v2607_v25, %v1215_v29  ;;  %v1307_v56 = vadd.f32 %v2607_v25, %v1206_v30 }
 0x2f2   :  { %v1672_v32 = vmul.f32 -1.442695, %v1310_v31  ;;  %v1669_v33 = vmul.f32 -1.442695, %v1307_v56 }
 0x2f3   :  { %v1212_v34 = vpop.xlane.xlu1 %1211 }
 0x2f4   :  { %1999 = vpow2.f32 %v1672_v32  ;;  %v1309_v35 = vadd.f32 %v2607_v25, %v1212_v34 }
 0x2f5   :  { %2001 = vpow2.f32 %v1669_v33  ;;  %v1218_v36 = vpop.xlane.xlu0 %1217 }
 0x2f6   :  { %v1671_v37 = vmul.f32 -1.442695, %v1309_v35  ;;  %v1311_v38 = vadd.f32 %v2607_v25, %v1218_v36 }
 0x2f7   :  { %v1221_v39 = vpop.xlane.xlu1 %1220 }
 0x2f8   :  { %2003 = vpow2.f32 %v1671_v37  ;;  %v1673_v40 = vmul.f32 -1.442695, %v1311_v38  ;;  %v1312_v41 = vadd.f32 %v2607_v25, %v1221_v39 }
 0x2f9   :  { %v1224_v42 = vpop.xlane.xlu0 %1223 }
 0x2fa   :  { %2005 = vpow2.f32 %v1673_v40  ;;  %v1674_v43 = vmul.f32 -1.442695, %v1312_v41  ;;  %v1313_v44 = vadd.f32 %v2607_v25, %v1224_v42 }
 0x2fb   :  { %v1227_v45 = vpop.xlane.xlu1 %1226 }
 0x2fc   :  { %2007 = vpow2.f32 %v1674_v43  ;;  %v1675_v46 = vmul.f32 -1.442695, %v1313_v44  ;;  %v1314_v47 = vadd.f32 %v2607_v25, %v1227_v45 }
 0x2fd   :  { %v1998_v49 = vpop.eup %1997  ;;  %v1230_v50 = vpop.xlane.xlu0 %1229 }
 0x2fe   :  { %v1436_v51 = vadd.f32 1.0, %v1998_v49  ;;  %2009 = vpow2.f32 %v1675_v46  ;;  %v1676_v52 = vmul.f32 -1.442695, %v1314_v47  ;;  %v1315_v18 = vadd.f32 %v2607_v25, %v1230_v50 }
 0x2ff   :  { %v1233_v54 = vpop.xlane.xlu1 %1232 }
 0x300   :  { %2011 = vrcp.f32 %v1436_v51  ;;  %v1677_v55 = vmul.f32 -1.442695, %v1315_v18  ;;  %v1316_v57 = vadd.f32 %v2607_v25, %v1233_v54 }
 0x301   :  { %v2000_v58 = vpop.eup %1999  ;;  %2013 = vpow2.f32 %v1676_v52  ;;  %v1236_v59 = vpop.xlane.xlu0 %1235 }
 0x302   :  { %v2002_v60 = vpop.eup %2001  ;;  %v1438_v61 = vadd.f32 1.0, %v2000_v58  ;;  %2015 = vpow2.f32 %v1677_v55  ;;  %v1678_v62 = vmul.f32 -1.442695, %v1316_v57  ;;  %v1317_v63 = vadd.f32 %v2607_v25, %v1236_v59 }
 0x303   :  { %v1435_v0 = vadd.f32 1.0, %v2002_v60  ;;  %v1239_v1 = vpop.xlane.xlu1 %1238 }
 0x304   :  { %2017 = vrcp.f32 %v1438_v61  ;;  %v1679_v2 = vmul.f32 -1.442695, %v1317_v63  ;;  %v1318_v3 = vadd.f32 %v2607_v25, %v1239_v1 }
 0x305   :  { %v2004_v4 = vpop.eup %2003  ;;  %2019 = vrcp.f32 %v1435_v0  ;;  %v1242_v5 = vpop.xlane.xlu0 %1241 }
 0x306   :  { %v1437_v6 = vadd.f32 1.0, %v2004_v4  ;;  %2021 = vpow2.f32 %v1678_v62  ;;  %v1680_v7 = vmul.f32 -1.442695, %v1318_v3  ;;  %v1319_v8 = vadd.f32 %v2607_v25, %v1242_v5 }
 0x307   :  { %v2006_v9 = vpop.eup %2005  ;;  %2023 = vpow2.f32 %v1679_v2  ;;  %v1245_v10 = vpop.xlane.xlu1 %1244 }
 0x308   :  { %2025 = vrcp.f32 %v1437_v6  ;;  %v1439_v11 = vadd.f32 1.0, %v2006_v9  ;;  %v1681_v12 = vmul.f32 -1.442695, %v1319_v8  ;;  %v1320_v13 = vadd.f32 %v2607_v25, %v1245_v10 }
 0x309   :  { %v2008_v14 = vpop.eup %2007  ;;  %2027 = vpow2.f32 %v1680_v7  ;;  %v1248_v15 = vpop.xlane.xlu0 %1247 }
 0x30a   :  { %2029 = vrcp.f32 %v1439_v11  ;;  %v1440_v16 = vadd.f32 1.0, %v2008_v14  ;;  %v1682_v17 = vmul.f32 -1.442695, %v1320_v13  ;;  %v1321_v19 = vadd.f32 %v2607_v25, %v1248_v15 }
 0x30b   :  { %v2010_v48 = vpop.eup %2009  ;;  %2031 = vpow2.f32 %v1681_v12  ;;  %v1251_v20 = vpop.xlane.xlu1 %1250 }
 0x30c   :  { %2033 = vrcp.f32 %v1440_v16  ;;  %v1441_v21 = vadd.f32 1.0, %v2010_v48  ;;  %v1683_v22 = vmul.f32 -1.442695, %v1321_v19  ;;  %v1322_v23 = vadd.f32 %v2607_v25, %v1251_v20 }
 0x30d   :  { %v2012_v24 = vpop.eup %2011  ;;  %2035 = vpow2.f32 %v1682_v17  ;;  %v1254_v53 = vpop.xlane.xlu0 %1253 }
 0x30e   :  { %v2014_v26 = vpop.eup %2013  ;;  %1533 = vst.msk [vmem:[%s2778_s9 + $0x8] sm:$0xff] %vm1531_vm3, %v2012_v24  ;;  %2037 = vrcp.f32 %v1441_v21  ;;  %v1684_v27 = vmul.f32 -1.442695, %v1322_v23  ;;  %v1323_v28 = vadd.f32 %v2607_v25, %v1254_v53 }
 0x30f   :  { %v2016_v29 = vpop.eup %2015  ;;  %v1442_v30 = vadd.f32 1.0, %v2014_v26  ;;  %2039 = vpow2.f32 %v1683_v22  ;;  %v1257_v31 = vpop.xlane.xlu1 %1256 }
 0x310   :  { %v1443_v56 = vadd.f32 1.0, %v2016_v29  ;;  %2041 = vpow2.f32 %v1684_v27  ;;  %v1685_v32 = vmul.f32 -1.442695, %v1323_v28  ;;  %v1324_v33 = vadd.f32 %v2607_v25, %v1257_v31 }
 0x311   :  { %v2018_v34 = vpop.eup %2017  ;;  %2043 = vrcp.f32 %v1442_v30  ;;  %v1260_v35 = vpop.xlane.xlu0 %1259 }
 0x312   :  { %v2020_v36 = vpop.eup %2019  ;;  %1535 = vst.msk [vmem:[%s2778_s9 + $0x18] sm:$0xff] %vm1531_vm3, %v2018_v34  ;;  %2045 = vrcp.f32 %v1443_v56  ;;  %v1686_v37 = vmul.f32 -1.442695, %v1324_v33  ;;  %v1325_v38 = vadd.f32 %v2607_v25, %v1260_v35 }
 0x313   :  { %v2022_v39 = vpop.eup %2021  ;;  %1532 = vst.msk [vmem:[%s2778_s9] sm:$0xff] %vm1531_vm3, %v2020_v36  ;;  %2047 = vpow2.f32 %v1685_v32  ;;  %v1263_v40 = vpop.xlane.xlu1 %1262 }
 0x314   :  { %v2024_v41 = vpop.eup %2023  ;;  %v1444_v42 = vadd.f32 1.0, %v2022_v39  ;;  %2049 = vpow2.f32 %v1686_v37  ;;  %v1687_v43 = vmul.f32 -1.442695, %v1325_v38  ;;  %v1326_v44 = vadd.f32 %v2607_v25, %v1263_v40 }
 0x315   :  { %v2026_v45 = vpop.eup %2025  ;;  %v1445_v46 = vadd.f32 1.0, %v2024_v41  ;;  %v1266_v47 = vpop.xlane.xlu0 %1265 }
 0x316   :  { %v2028_v49 = vpop.eup %2027  ;;  %1534 = vst.msk [vmem:[%s2778_s9 + $0x10] sm:$0xff] %vm1531_vm3, %v2026_v45  ;;  %2051 = vrcp.f32 %v1444_v42  ;;  %v1688_v50 = vmul.f32 -1.442695, %v1326_v44  ;;  %v1327_v51 = vadd.f32 %v2607_v25, %v1266_v47 }
 0x317   :  { %v2030_v52 = vpop.eup %2029  ;;  %2053 = vrcp.f32 %v1445_v46  ;;  %v1446_v18 = vadd.f32 1.0, %v2028_v49  ;;  %v1269_v54 = vpop.xlane.xlu1 %1268 }
 0x318   :  { %v2032_v55 = vpop.eup %2031  ;;  %1536 = vst.msk [vmem:[%s2778_s9 + $0x20] sm:$0xff] %vm1531_vm3, %v2030_v52  ;;  %2055 = vpow2.f32 %v1687_v43  ;;  %v1689_v57 = vmul.f32 -1.442695, %v1327_v51  ;;  %v1328_v58 = vadd.f32 %v2607_v25, %v1269_v54 }
 0x319   :  { %v2034_v59 = vpop.eup %2033  ;;  %2057 = vrcp.f32 %v1446_v18  ;;  %v1447_v60 = vadd.f32 1.0, %v2032_v55  ;;  %v1272_v61 = vpop.xlane.xlu0 %1271 }
 0x31a   :  { %v2036_v62 = vpop.eup %2035  ;;  %1537 = vst.msk [vmem:[%s2778_s9 + $0x28] sm:$0xff] %vm1531_vm3, %v2034_v59  ;;  %2059 = vpow2.f32 %v1688_v50  ;;  %v1690_v63 = vmul.f32 -1.442695, %v1328_v58  ;;  %v1329_v0 = vadd.f32 %v2607_v25, %v1272_v61 }
 0x31b   :  { %v2038_v1 = vpop.eup %2037  ;;  %2061 = vrcp.f32 %v1447_v60  ;;  %v1448_v2 = vadd.f32 1.0, %v2036_v62  ;;  %v1275_v3 = vpop.xlane.xlu1 %1274 }
 0x31c   :  { %v2040_v4 = vpop.eup %2039  ;;  %1538 = vst.msk [vmem:[%s2778_s9 + $0x30] sm:$0xff] %vm1531_vm3, %v2038_v1  ;;  %2063 = vpow2.f32 %v1689_v57  ;;  %v1330_v5 = vadd.f32 %v2607_v25, %v1275_v3  ;;  %v1691_v8 = vmul.f32 -1.442695, %v1329_v0 }
 0x31d   :  { %v2042_v6 = vpop.eup %2041  ;;  %2065 = vrcp.f32 %v1448_v2  ;;  %v1449_v7 = vadd.f32 1.0, %v2040_v4  ;;  %v1278_v9 = vpop.xlane.xlu0 %1277 }
 0x31e   :  { %v2044_v10 = vpop.eup %2043  ;;  %v1450_v11 = vadd.f32 1.0, %v2042_v6  ;;  %2067 = vpow2.f32 %v1690_v63  ;;  %v1692_v12 = vmul.f32 -1.442695, %v1330_v5  ;;  %v1331_v13 = vadd.f32 %v2607_v25, %v1278_v9 }
 0x31f   :  { %v2046_v14 = vpop.eup %2045  ;;  %1539 = vst.msk [vmem:[%s2778_s9 + $0x38] sm:$0xff] %vm1531_vm3, %v2044_v10  ;;  %2069 = vrcp.f32 %v1449_v7  ;;  %v1281_v15 = vpop.xlane.xlu1 %1280 }
 0x320   :  { %v2048_v16 = vpop.eup %2047  ;;  %1540 = vst.msk [vmem:[%s2778_s9 + $0x40] sm:$0xff] %vm1531_vm3, %v2046_v14  ;;  %2071 = vrcp.f32 %v1450_v11  ;;  %v1332_v17 = vadd.f32 %v2607_v25, %v1281_v15  ;;  %v1693_v20 = vmul.f32 -1.442695, %v1331_v13 }
 0x321   :  { %v2050_v19 = vpop.eup %2049  ;;  %v1451_v48 = vadd.f32 1.0, %v2048_v16  ;;  %2073 = vpow2.f32 %v1691_v8  ;;  %v1284_v21 = vpop.xlane.xlu0 %1283 }
 0x322   :  { %v1452_v22 = vadd.f32 1.0, %v2050_v19  ;;  %2075 = vpow2.f32 %v1692_v12  ;;  %v1694_v23 = vmul.f32 -1.442695, %v1332_v17  ;;  %v1333_v24 = vadd.f32 %v2607_v25, %v1284_v21 }
 0x323   :  { %v2052_v53 = vpop.eup %2051  ;;  %2077 = vrcp.f32 %v1451_v48  ;;  %v1287_v26 = vpop.xlane.xlu1 %1286 }
 0x324   :  { %v2054_v27 = vpop.eup %2053  ;;  %1541 = vst.msk [vmem:[%s2778_s9 + $0x48] sm:$0xff] %vm1531_vm3, %v2052_v53  ;;  %2079 = vrcp.f32 %v1452_v22  ;;  %v1695_v28 = vmul.f32 -1.442695, %v1333_v24  ;;  %v1334_v29 = vadd.f32 %v2607_v25, %v1287_v26 }
 0x325   :  { %v2056_v30 = vpop.eup %2055  ;;  %1542 = vst.msk [vmem:[%s2778_s9 + $0x50] sm:$0xff] %vm1531_vm3, %v2054_v27  ;;  %2081 = vpow2.f32 %v1693_v20  ;;  %v1290_v31 = vpop.xlane.xlu0 %1289 }
 0x326   :  { %v2058_v56 = vpop.eup %2057  ;;  %v1453_v32 = vadd.f32 1.0, %v2056_v30  ;;  %2083 = vpow2.f32 %v1694_v23  ;;  %v1696_v33 = vmul.f32 -1.442695, %v1334_v29  ;;  %v1335_v34 = vadd.f32 %v2607_v25, %v1290_v31 }
 0x327   :  { %v2060_v35 = vpop.eup %2059  ;;  %1543 = vst.msk [vmem:[%s2778_s9 + $0x58] sm:$0xff] %vm1531_vm3, %v2058_v56  ;;  %2085 = vpow2.f32 %v1695_v28  ;;  %v1293_v36 = vpop.xlane.xlu1 %1292 }
 0x328   :  { %v2062_v37 = vpop.eup %2061  ;;  %2087 = vrcp.f32 %v1453_v32  ;;  %v1454_v38 = vadd.f32 1.0, %v2060_v35  ;;  %v1697_v39 = vmul.f32 -1.442695, %v1335_v34  ;;  %v1336_v40 = vadd.f32 %v2607_v25, %v1293_v36 }
 0x329   :  { %v2064_v41 = vpop.eup %2063  ;;  %1544 = vst.msk [vmem:[%s2778_s9 + $0x60] sm:$0xff] %vm1531_vm3, %v2062_v37  ;;  %2089 = vpow2.f32 %v1696_v33  ;;  %v1296_v42 = vpop.xlane.xlu0 %1295 }
 0x32a   :  { %v2066_v43 = vpop.eup %2065  ;;  %2091 = vrcp.f32 %v1454_v38  ;;  %v1455_v44 = vadd.f32 1.0, %v2064_v41  ;;  %v1698_v45 = vmul.f32 -1.442695, %v1336_v40  ;;  %v1337_v46 = vadd.f32 %v2607_v25, %v1296_v42 }
 0x32b   :  { %v2068_v47 = vpop.eup %2067  ;;  %1545 = vst.msk [vmem:[%s2778_s9 + $0x68] sm:$0xff] %vm1531_vm3, %v2066_v43  ;;  %2093 = vpow2.f32 %v1697_v39  ;;  %v1299_v49 = vpop.xlane.xlu1 %1298 }
 0x32c   :  { %v2070_v50 = vpop.eup %2069  ;;  %2095 = vrcp.f32 %v1455_v44  ;;  %v1456_v51 = vadd.f32 1.0, %v2068_v47  ;;  %v1699_v52 = vmul.f32 -1.442695, %v1337_v46  ;;  %v1338_v18 = vadd.f32 %v2607_v25, %v1299_v49 }
 0x32d   :  { %v2072_v54 = vpop.eup %2071  ;;  %1546 = vst.msk [vmem:[%s2778_s9 + $0x70] sm:$0xff] %vm1531_vm3, %v2070_v50  ;;  %2097 = vpow2.f32 %v1698_v45 }
 0x32e   :  { %v2074_v55 = vpop.eup %2073  ;;  %1547 = vst.msk [vmem:[%s2778_s9 + $0x78] sm:$0xff] %vm1531_vm3, %v2072_v54  ;;  %2099 = vrcp.f32 %v1456_v51  ;;  %v1700_v57 = vmul.f32 -1.442695, %v1338_v18 }
 0x32f   :  { %v2076_v58 = vpop.eup %2075  ;;  %v1457_v59 = vadd.f32 1.0, %v2074_v55  ;;  %2101 = vpow2.f32 %v1699_v52 }
 0x330   :  { %v2078_v60 = vpop.eup %2077  ;;  %v1458_v25 = vadd.f32 1.0, %v2076_v58  ;;  %2103 = vpow2.f32 %v1700_v57 }
 0x331   :  { %v2080_v61 = vpop.eup %2079  ;;  %1548 = vst.msk [vmem:[%s2778_s9 + $0x80] sm:$0xff] %vm1531_vm3, %v2078_v60  ;;  %2105 = vrcp.f32 %v1457_v59 }
 0x332   :  { %v2082_v62 = vpop.eup %2081  ;;  %1549 = vst.msk [vmem:[%s2778_s9 + $0x88] sm:$0xff] %vm1531_vm3, %v2080_v61  ;;  %2107 = vrcp.f32 %v1458_v25 }
 0x333   :  { %v2084_v63 = vpop.eup %2083  ;;  %v1459_v0 = vadd.f32 1.0, %v2082_v62 }
 0x334   :  { %v2086_v1 = vpop.eup %2085  ;;  %v1460_v2 = vadd.f32 1.0, %v2084_v63 }
 0x335   :  { %v2088_v3 = vpop.eup %2087  ;;  %2109 = vrcp.f32 %v1459_v0  ;;  %v1461_v4 = vadd.f32 1.0, %v2086_v1 }
 0x336   :  { %v2090_v5 = vpop.eup %2089  ;;  %1550 = vst.msk [vmem:[%s2778_s9 + $0x90] sm:$0xff] %vm1531_vm3, %v2088_v3  ;;  %2111 = vrcp.f32 %v1460_v2 }
 0x337   :  { %v2092_v6 = vpop.eup %2091  ;;  %2113 = vrcp.f32 %v1461_v4  ;;  %v1462_v7 = vadd.f32 1.0, %v2090_v5 }
 0x338   :  { %v2094_v8 = vpop.eup %2093  ;;  %1551 = vst.msk [vmem:[%s2778_s9 + $0x98] sm:$0xff] %vm1531_vm3, %v2092_v6 }
 0x339   :  { %v2096_v9 = vpop.eup %2095  ;;  %2115 = vrcp.f32 %v1462_v7  ;;  %v1463_v10 = vadd.f32 1.0, %v2094_v8 }
 0x33a   :  { %v2098_v11 = vpop.eup %2097  ;;  %1552 = vst.msk [vmem:[%s2778_s9 + $0xa0] sm:$0xff] %vm1531_vm3, %v2096_v9 }
 0x33b   :  { %v2100_v12 = vpop.eup %2099  ;;  %2117 = vrcp.f32 %v1463_v10  ;;  %v1464_v13 = vadd.f32 1.0, %v2098_v11 }
 0x33c   :  { %v2102_v14 = vpop.eup %2101  ;;  %1553 = vst.msk [vmem:[%s2778_s9 + $0xa8] sm:$0xff] %vm1531_vm3, %v2100_v12 }
 0x33d   :  { %v2104_v15 = vpop.eup %2103  ;;  %2119 = vrcp.f32 %v1464_v13  ;;  %v1465_v16 = vadd.f32 1.0, %v2102_v14 }
 0x33e   :  { %v2106_v17 = vpop.eup %2105  ;;  %v1466_v19 = vadd.f32 1.0, %v2104_v15 }
 0x33f   :  { %v2108_v48 = vpop.eup %2107  ;;  %1554 = vst.msk [vmem:[%s2778_s9 + $0xb0] sm:$0xff] %vm1531_vm3, %v2106_v17  ;;  %2121 = vrcp.f32 %v1465_v16 }
 0x340   :  { %1555 = vst.msk [vmem:[%s2778_s9 + $0xb8] sm:$0xff] %vm1531_vm3, %v2108_v48  ;;  %2123 = vrcp.f32 %v1466_v19 }
 0x342   :  { %v2110_v20 = vpop.eup %2109 }
 0x343   :  { %v2112_v21 = vpop.eup %2111  ;;  %1556 = vst.msk [vmem:[%s2778_s9 + $0xc0] sm:$0xff] %vm1531_vm3, %v2110_v20 }
 0x344   :  { %v2114_v22 = vpop.eup %2113  ;;  %1557 = vst.msk [vmem:[%s2778_s9 + $0xc8] sm:$0xff] %vm1531_vm3, %v2112_v21 }
 0x345   :  { %1558 = vst.msk [vmem:[%s2778_s9 + $0xd0] sm:$0xff] %vm1531_vm3, %v2114_v22 }
 0x346   :  { %v2116_v23 = vpop.eup %2115 }
 0x347   :  { %1559 = vst.msk [vmem:[%s2778_s9 + $0xd8] sm:$0xff] %vm1531_vm3, %v2116_v23 }
 0x348   :  { %v2118_v24 = vpop.eup %2117 }
 0x349   :  { %1560 = vst.msk [vmem:[%s2778_s9 + $0xe0] sm:$0xff] %vm1531_vm3, %v2118_v24 }
 0x34a   :  { %v2120_v53 = vpop.eup %2119 }
 0x34b   :  { %1561 = vst.msk [vmem:[%s2778_s9 + $0xe8] sm:$0xff] %vm1531_vm3, %v2120_v53 }
 0x34c   :  { %v2122_v26 = vpop.eup %2121 }
 0x34d   :  { %v2124_v27 = vpop.eup %2123  ;;  %1562 = vst.msk [vmem:[%s2778_s9 + $0xf0] sm:$0xff] %vm1531_vm3, %v2122_v26 }
 0x34e   :  { %1563 = vst.msk [vmem:[%s2778_s9 + $0xf8] sm:$0xff] %vm1531_vm3, %v2124_v27 }

</bundles_post_ra>
